<compile_context>
chip_gen: v6e
topology: v6e:2x2x1
jax: 0.10.0
libtpu: 0.0.40
codegen_flags: <defaults>
</compile_context>

<pallas_src>
import functools
import numpy as np
import jax
import jax.numpy as jnp
from jax.experimental import pallas as pl

# ----------------- config (small synthetic shapes) -----------------
N_ITEMS = 20      # vocabulary size (input_size)
HIDDEN = 32       # args.hidden_size
N_LAYERS = 1      # args.n_layers (GNN steps)
BATCH = 2         # batch size
SEQLEN = 8        # max session length (= max_n_nodes)


def _r8(x):   return int(-(-x // 8) * 8)
def _r16(x):  return int(-(-x // 16) * 16)
def _r128(x): return int(-(-x // 128) * 128)


def make_cfg(batch, seqlen, hidden, n_items, n_layers):
    b, l, h = batch, seqlen, hidden
    n = l                              # max_n_nodes == max session length
    bn, bl = b * n, b * l
    ni_pad = _r16(n_items)
    # --- struct slab (f32): emb one-hots | block-diag A_in/A_out | alias+last selector | mask
    s_oh = 0
    s_a = _r8(s_oh + bn)
    s_sel = _r8(s_a + bn)
    s_msk = _r8(s_sel + bl + b)
    s_rows = _r8(s_msk + b)
    s_lanes = max(ni_pad, 2 * bn, bl)
    # --- packed weight slab (bf16), row offsets 16-aligned for bf16 sublane packing
    w_edge = 0
    w_ih = _r16(w_edge + h)
    w_hh = _r16(w_ih + 2 * h)
    w_att = _r16(w_hh + h)
    w_t = _r16(w_att + h)
    w_emb = _r16(w_t + 2 * h)
    w_rows = _r16(w_emb + ni_pad)
    w_lanes = _r128(3 * h)
    # --- bias slab (f32)
    b_lanes = _r128(4 * h)
    return dict(B=b, L=l, N=n, H=h, BN=bn, BL=bl, n_items=n_items, ni_pad=ni_pad,
                n_layers=n_layers,
                s_oh=s_oh, s_a=s_a, s_sel=s_sel, s_msk=s_msk,
                s_rows=s_rows, s_lanes=s_lanes,
                w_edge=w_edge, w_ih=w_ih, w_hh=w_hh, w_att=w_att, w_t=w_t,
                w_emb=w_emb, w_rows=w_rows, w_lanes=w_lanes, b_lanes=b_lanes)


# ----------------- host-side graph construction (SRGNN._get_slice) -----------------
# TODO(synk): data-dependent graph build (np.unique / np.where loops) has no clean
# Pallas equivalent; kept on host numpy exactly as the PyTorch reference does.
def get_slice(seqs_np, n_items):
    mask = (seqs_np > 0)
    items, A_in, A_out, alias_inputs = [], [], [], []
    max_n_nodes = seqs_np.shape[1]
    for seq in seqs_np:
        node = np.unique(seq)
        node = np.clip(node, 0, n_items - 1)           # reference clips node AFTER unique
        items.append(node.tolist() + (max_n_nodes - len(node)) * [0])
        u_A = np.zeros((max_n_nodes, max_n_nodes))
        for i in np.arange(len(seq) - 1):
            if seq[i + 1] == 0:
                break
            u = np.where(node == seq[i])[0][0]
            v = np.where(node == seq[i + 1])[0][0]
            u_A[u][v] = 1
        u_sum_in = np.sum(u_A, 0)
        u_sum_in[np.where(u_sum_in == 0)] = 1
        u_A_in = np.divide(u_A, u_sum_in)
        u_sum_out = np.sum(u_A, 1)
        u_sum_out[np.where(u_sum_out == 0)] = 1
        u_A_out = np.divide(u_A.transpose(), u_sum_out)
        u_A = np.concatenate([u_A_in, u_A_out]).transpose()   # (N, 2N) as in the reference
        A_in.append(u_A[:, :max_n_nodes])
        A_out.append(u_A[:, max_n_nodes:])
        alias_inputs.append([np.where(node == i)[0][0] for i in seq if i in node])
    return (np.asarray(alias_inputs, dtype=np.int32),
            np.asarray(A_in, dtype=np.float32),
            np.asarray(A_out, dtype=np.float32),
            np.asarray(items, dtype=np.int32),
            mask.astype(np.float32))


# ----------------- fused Pallas kernel -----------------
def srgnn_fused_kernel(struct_ref, w_ref, b_ref, seqh_ref, out_ref, *, cfg):
    B, L, H = cfg['B'], cfg['L'], cfg['H']
    BN, BL = cfg['BN'], cfg['BL']
    f32, bf16 = jnp.float32, jnp.bfloat16

    # ---- structure matrices (one f32 slab, static sub-window loads) ----
    onehot = struct_ref[cfg['s_oh']:cfg['s_oh'] + BN, 0:cfg['ni_pad']].astype(bf16)  # (BN, NIp)
    a_in   = struct_ref[cfg['s_a']:cfg['s_a'] + BN, 0:BN].astype(bf16)               # (BN, BN)
    a_out  = struct_ref[cfg['s_a']:cfg['s_a'] + BN, BN:2 * BN].astype(bf16)          # (BN, BN)
    sel    = struct_ref[cfg['s_sel']:cfg['s_sel'] + BL + B, 0:BN].astype(bf16)       # (BL+B, BN)
    maskm  = struct_ref[cfg['s_msk']:cfg['s_msk'] + B, 0:BL].astype(bf16)            # (B, BL)

    # ---- packed weights (bf16) / biases (f32), static slab slices ----
    w_edge = w_ref[cfg['w_edge']:cfg['w_edge'] + H, 0:2 * H]          # (H, 2H)
    w_ih_p = w_ref[cfg['w_ih']:cfg['w_ih'] + 2 * H, 0:3 * H]          # (2H, 3H)
    w_hh_p = w_ref[cfg['w_hh']:cfg['w_hh'] + H, 0:3 * H]              # (H, 3H)
    w1 = w_ref[cfg['w_att']:cfg['w_att'] + H, 0:H]
    w2 = w_ref[cfg['w_att']:cfg['w_att'] + H, H:2 * H]
    w3 = w_ref[cfg['w_att']:cfg['w_att'] + H, 2 * H:3 * H]
    w_t_p = w_ref[cfg['w_t']:cfg['w_t'] + 2 * H, 0:H]                 # (2H, H)
    emb = w_ref[cfg['w_emb']:cfg['w_emb'] + cfg['ni_pad'], 0:H]       # (NIp, H)

    b_edge = b_ref[0:1, 0:2 * H]
    b_ah   = b_ref[0:1, 2 * H:4 * H]
    b_ih   = b_ref[1:2, 0:3 * H]
    b_hh   = b_ref[2:3, 0:3 * H]
    b1 = b_ref[3:4, 0:H]
    b2 = b_ref[3:4, H:2 * H]
    b3 = b_ref[3:4, 2 * H:3 * H]
    bt = b_ref[3:4, 3 * H:4 * H]

    # ---- fused embedding lookup: one-hot @ emb (bf16-in / f32-acc) ----
    h = jnp.dot(onehot, emb, preferred_element_type=f32)              # (BN, H) f32

    # bias broadcasts hoisted out of the layer loop (JAX does not CSE broadcast_in_dim)
    b_edge_b = jnp.broadcast_to(b_edge, (BN, 2 * H))
    b_ah_b   = jnp.broadcast_to(b_ah, (BN, 2 * H))
    b_ih_b   = jnp.broadcast_to(b_ih, (BN, 3 * H))
    b_hh_b   = jnp.broadcast_to(b_hh, (BN, 3 * H))

    # ---- gated-GNN step(s); hidden stays resident in vregs/VMEM ----
    # TODO(synk): switch to lax.fori_loop(..., unroll=True) if n_layers grows large.
    for _ in range(cfg['n_layers']):
        hb = h.astype(bf16)
        edge = jnp.dot(hb, w_edge, preferred_element_type=f32) + b_edge_b        # (BN, 2H)
        inp_in = jnp.dot(a_in, edge[:, 0:H].astype(bf16), preferred_element_type=f32)
        inp_out = jnp.dot(a_out, edge[:, H:2 * H].astype(bf16), preferred_element_type=f32)
        inp_cat = jnp.concatenate([inp_in, inp_out], axis=-1) + b_ah_b           # (BN, 2H)
        gi = jnp.dot(inp_cat.astype(bf16), w_ih_p, preferred_element_type=f32) + b_ih_b
        gh = jnp.dot(hb, w_hh_p, preferred_element_type=f32) + b_hh_b
        resetgate = jax.nn.sigmoid(gi[:, 0:H] + gh[:, 0:H])
        inputgate = jax.nn.sigmoid(gi[:, H:2 * H] + gh[:, H:2 * H])
        newgate = jnp.tanh(gi[:, 2 * H:3 * H] + resetgate * gh[:, 2 * H:3 * H])
        h = newgate + inputgate * (h - newgate)

    # ---- readout: alias gather + last-item select as ONE selector matmul ----
    hb = h.astype(bf16)
    gathered = jnp.dot(sel, hb, preferred_element_type=f32)           # (BL + B, H)
    seq_h = gathered[0:BL]                                            # (BL, H)
    ht = gathered[BL:BL + B]                                          # (B, H)

    q1 = jnp.dot(ht.astype(bf16), w1, preferred_element_type=f32) + b1           # (B, H)
    q2 = jnp.dot(seq_h.astype(bf16), w2, preferred_element_type=f32) + b2        # (BL, H)
    q1r = jnp.broadcast_to(q1.reshape(B, 1, H), (B, L, H)).reshape(BL, H)
    alp = jnp.dot(jax.nn.sigmoid(q1r + q2).astype(bf16), w3,
                  preferred_element_type=f32) + b3                               # (BL, H)

    # masked sum over positions folded into one (B, BL) @ (BL, H) matmul
    a = jnp.dot(maskm, (alp * seq_h).astype(bf16), preferred_element_type=f32)   # (B, H)

    # linear_transform(cat([a, ht])) as a single 64-lane-wide dot
    aht = jnp.concatenate([a, ht], axis=-1).astype(bf16)                          # (B, 2H)
    out = jnp.dot(aht, w_t_p, preferred_element_type=f32) + bt                    # (B, H)

    seqh_ref[...] = seq_h
    out_ref[...] = out


def srgnn_fused(struct, w_slab, b_slab, cfg):
    kernel = functools.partial(srgnn_fused_kernel, cfg=cfg)
    return pl.pallas_call(
        kernel,
        out_shape=(jax.ShapeDtypeStruct((cfg['BL'], cfg['H']), jnp.float32),
                   jax.ShapeDtypeStruct((cfg['B'], cfg['H']), jnp.float32)),
    )(struct, w_slab, b_slab)


# ----------------- parameter init (deterministic, uniform(-stdv, stdv)) -----------------
def init_params(key, n_items, h):
    stdv = 1.0 / np.sqrt(h)
    shapes = {
        'emb': (n_items, h),
        'w_ein': (h, h), 'b_ein': (1, h),
        'w_eout': (h, h), 'b_eout': (1, h),
        'w_ih': (3 * h, 2 * h), 'b_ih': (1, 3 * h),
        'w_hh': (3 * h, h), 'b_hh': (1, 3 * h),
        'b_iah': (1, h), 'b_oah': (1, h),
        'w1': (h, h), 'b1': (1, h),
        'w2': (h, h), 'b2': (1, h),
        'w3': (h, h), 'b3': (1, h),
        'wt': (h, 2 * h), 'bt': (1, h),
    }
    params = {}
    names = sorted(shapes)
    keys = jax.random.split(key, len(names))
    for k, name in zip(keys, names):
        params[name] = jax.random.uniform(k, shapes[name], jnp.float32, -stdv, stdv)
    return params


def prepare_weights(p, cfg):
    """Pack all weights (pre-transposed to (in,out)) into one bf16 slab and all
    biases into one f32 slab, so the kernel gets 2 parameter DMAs total."""
    h = cfg['H']
    W = np.zeros((cfg['w_rows'], cfg['w_lanes']), np.float32)

    def put(r, arr):
        arr = np.asarray(arr)
        W[r:r + arr.shape[0], 0:arr.shape[1]] = arr

    put(cfg['w_edge'], np.concatenate([np.asarray(p['w_ein']).T,
                                       np.asarray(p['w_eout']).T], axis=1))     # (H, 2H)
    put(cfg['w_ih'], np.asarray(p['w_ih']).T)                                   # (2H, 3H)
    put(cfg['w_hh'], np.asarray(p['w_hh']).T)                                   # (H, 3H)
    put(cfg['w_att'], np.concatenate([np.asarray(p['w1']).T, np.asarray(p['w2']).T,
                                      np.asarray(p['w3']).T], axis=1))          # (H, 3H)
    put(cfg['w_t'], np.asarray(p['wt']).T)                                      # (2H, H)
    put(cfg['w_emb'], np.asarray(p['emb']))                                     # (NI, H)

    Bm = np.zeros((8, cfg['b_lanes']), np.float32)
    Bm[0, 0:2 * h] = np.concatenate([np.asarray(p['b_ein'])[0], np.asarray(p['b_eout'])[0]])
    Bm[0, 2 * h:4 * h] = np.concatenate([np.asarray(p['b_iah'])[0], np.asarray(p['b_oah'])[0]])
    Bm[1, 0:3 * h] = np.asarray(p['b_ih'])[0]
    Bm[2, 0:3 * h] = np.asarray(p['b_hh'])[0]
    Bm[3, 0:h] = np.asarray(p['b1'])[0]
    Bm[3, h:2 * h] = np.asarray(p['b2'])[0]
    Bm[3, 2 * h:3 * h] = np.asarray(p['b3'])[0]
    Bm[3, 3 * h:4 * h] = np.asarray(p['bt'])[0]
    return jnp.asarray(W, jnp.bfloat16), jnp.asarray(Bm, jnp.float32)


# ----------------- host-built structure slab (one-hots / block-diag A / selector / mask) ---
def build_struct(cfg, alias_np, A_in_np, A_out_np, items_np, mask_np, lens_np):
    B, N, L = cfg['B'], cfg['N'], cfg['L']
    BN = B * N
    s = np.zeros((cfg['s_rows'], cfg['s_lanes']), np.float32)
    for b in range(B):
        # embedding one-hot rows
        for j in range(N):
            s[cfg['s_oh'] + b * N + j, int(items_np[b, j])] = 1.0
        # block-diagonal A_in | A_out
        r0 = cfg['s_a'] + b * N
        s[r0:r0 + N, b * N:(b + 1) * N] = A_in_np[b]
        s[r0:r0 + N, BN + b * N:BN + (b + 1) * N] = A_out_np[b]
        # alias scatter-back selector + last-item selector
        for l in range(L):
            s[cfg['s_sel'] + b * L + l, b * N + int(alias_np[b, l])] = 1.0
        last = max(int(lens_np[b]) - 1, 0)                     # guard empty sessions
        s[cfg['s_sel'] + B * L + b, b * N + int(alias_np[b, last])] = 1.0
        # mask (folded into the readout contraction)
        s[cfg['s_msk'] + b, b * L:(b + 1) * L] = mask_np[b]
    return s


# ----------------- SRGNN / VICReg forward -----------------
def srgnn_forward(cfg, w_slab, b_slab, seqs_np, lens_np):
    alias_np, A_in_np, A_out_np, items_np, mask_np = get_slice(seqs_np, cfg['n_items'])
    lens_np = np.maximum(np.asarray(lens_np, np.int64), 1)
    struct_np = build_struct(cfg, alias_np, A_in_np, A_out_np, items_np, mask_np, lens_np)
    seqh_flat, seq_out = srgnn_fused(jnp.asarray(struct_np), w_slab, b_slab, cfg)
    return seqh_flat.reshape(cfg['B'], cfg['L'], cfg['H']), seq_out


def vicreg_forward(cfg, w_slab, b_slab, seqs_np, lens_np):
    # VICReg.forward just routes through the SRGNN backbone and returns (hidden, preds)
    return srgnn_forward(cfg, w_slab, b_slab, seqs_np, lens_np)


# ----------------- pure-numpy reference (mirrors the PyTorch math, f64) -----------------
def reference_forward(params, seqs_np, lens_np, n_items, n_layers):
    p = {k: np.asarray(v, np.float64) for k, v in params.items()}
    alias, A_in, A_out, items, mask = get_slice(seqs_np, n_items)
    B, L = seqs_np.shape
    H = p['emb'].shape[1]
    lens = np.maximum(np.asarray(lens_np, np.int64), 1)
    sig = lambda x: 1.0 / (1.0 + np.exp(-x))
    h = p['emb'][items]                                                  # (B, N, H)
    for _ in range(n_layers):
        ein = h @ p['w_ein'].T + p['b_ein']
        eout = h @ p['w_eout'].T + p['b_eout']
        inp_in = np.einsum('bij,bjh->bih', A_in, ein) + p['b_iah']
        inp_out = np.einsum('bij,bjh->bih', A_out, eout) + p['b_oah']
        inputs = np.concatenate([inp_in, inp_out], axis=2)
        gi = inputs @ p['w_ih'].T + p['b_ih']
        gh = h @ p['w_hh'].T + p['b_hh']
        i_r, i_i, i_n = np.split(gi, 3, axis=2)
        h_r, h_i, h_n = np.split(gh, 3, axis=2)
        r = sig(i_r + h_r)
        z = sig(i_i + h_i)
        ng = np.tanh(i_n + r * h_n)
        h = ng + z * (h - ng)
    idx = np.repeat(alias[..., None].astype(np.int64), H, axis=2)
    seq_hidden = np.take_along_axis(h, idx, axis=1)                      # (B, L, H)
    ht = seq_hidden[np.arange(B), lens - 1]                              # (B, H)
    q1 = (ht @ p['w1'].T + p['b1'])[:, None, :]
    q2 = seq_hidden @ p['w2'].T + p['b2']
    alp = sig(q1 + q2) @ p['w3'].T + p['b3']
    a = np.sum(alp * seq_hidden * mask[:, :, None], axis=1)
    seq_out = np.concatenate([a, ht], axis=1) @ p['wt'].T + p['bt']
    return seq_hidden, seq_out


if __name__ == "__main__":
    key = jax.random.PRNGKey(0)
    pkey, skey = jax.random.split(key)
    params = init_params(pkey, N_ITEMS, HIDDEN)
    cfg = make_cfg(BATCH, SEQLEN, HIDDEN, N_ITEMS, N_LAYERS)
    w_slab, b_slab = prepare_weights(params, cfg)

    # deterministic synthetic session batch: item ids in [1, N_ITEMS), zero-padded tail
    seqs = jax.random.randint(skey, (BATCH, SEQLEN), 1, N_ITEMS, dtype=jnp.int32)
    seqs_np = np.array(jax.device_get(seqs))                # writable copy
    seqs_np[1, 5:] = 0                                      # row 1 has length 5
    lens_np = (seqs_np > 0).sum(axis=1).astype(np.int32)

    seq_hidden, seq_output = vicreg_forward(cfg, w_slab, b_slab, seqs_np, lens_np)
    jax.block_until_ready((seq_hidden, seq_output))

    assert seq_hidden.shape == (BATCH, SEQLEN, HIDDEN)
    assert seq_output.shape == (BATCH, HIDDEN)
    assert np.all(np.isfinite(np.asarray(seq_hidden)))
    assert np.all(np.isfinite(np.asarray(seq_output)))

    # numerical check against the pure-numpy reference (loose tolerance: bf16 MXU inputs)
    ref_h, ref_o = reference_forward(params, seqs_np, lens_np, N_ITEMS, N_LAYERS)
    np.testing.assert_allclose(np.asarray(seq_hidden), ref_h, atol=5e-2, rtol=5e-2)
    np.testing.assert_allclose(np.asarray(seq_output), ref_o, atol=5e-2, rtol=5e-2)

    print("KERNEL_OK")
</pallas_src>

<mosaic_0001>
module attributes {stable_mosaic.version = 11 : i64} {
  func.func @srgnn_fused_kernel(%arg0: memref<64x32xf32, #tpu.memory_space<vmem>>, %arg1: memref<256x128xbf16, #tpu.memory_space<vmem>>, %arg2: memref<8x128xf32, #tpu.memory_space<vmem>>, %arg3: memref<16x32xf32, #tpu.memory_space<vmem>>, %arg4: memref<2x32xf32, #tpu.memory_space<vmem>>) attributes {dimension_semantics = [], scalar_prefetch = 0 : i64, scratch_operands = 0 : i64, tpu.core_type = #tpu.core_type<tc>} {
    %c0 = arith.constant 0 : index
    %c0_0 = arith.constant 0 : index
    %0 = vector.load %arg0[%c0, %c0_0] : memref<64x32xf32, #tpu.memory_space<vmem>>, vector<16x32xf32>
    %1 = arith.truncf %0 : vector<16x32xf32> to vector<16x32xbf16>
    %c16 = arith.constant 16 : index
    %c0_1 = arith.constant 0 : index
    %2 = vector.load %arg0[%c16, %c0_1] : memref<64x32xf32, #tpu.memory_space<vmem>>, vector<16x16xf32>
    %3 = arith.truncf %2 : vector<16x16xf32> to vector<16x16xbf16>
    %c16_2 = arith.constant 16 : index
    %c16_3 = arith.constant 16 : index
    %4 = vector.load %arg0[%c16_2, %c16_3] : memref<64x32xf32, #tpu.memory_space<vmem>>, vector<16x16xf32>
    %5 = arith.truncf %4 : vector<16x16xf32> to vector<16x16xbf16>
    %c32 = arith.constant 32 : index
    %c0_4 = arith.constant 0 : index
    %6 = vector.load %arg0[%c32, %c0_4] : memref<64x32xf32, #tpu.memory_space<vmem>>, vector<18x16xf32>
    %7 = arith.truncf %6 : vector<18x16xf32> to vector<18x16xbf16>
    %c56 = arith.constant 56 : index
    %c0_5 = arith.constant 0 : index
    %8 = vector.load %arg0[%c56, %c0_5] : memref<64x32xf32, #tpu.memory_space<vmem>>, vector<2x16xf32>
    %9 = arith.truncf %8 : vector<2x16xf32> to vector<2x16xbf16>
    %c0_6 = arith.constant 0 : index
    %c0_7 = arith.constant 0 : index
    %10 = vector.load %arg1[%c0_6, %c0_7] : memref<256x128xbf16, #tpu.memory_space<vmem>>, vector<32x64xbf16>
    %c32_8 = arith.constant 32 : index
    %c0_9 = arith.constant 0 : index
    %11 = vector.load %arg1[%c32_8, %c0_9] : memref<256x128xbf16, #tpu.memory_space<vmem>>, vector<64x96xbf16>
    %c96 = arith.constant 96 : index
    %c0_10 = arith.constant 0 : index
    %12 = vector.load %arg1[%c96, %c0_10] : memref<256x128xbf16, #tpu.memory_space<vmem>>, vector<32x96xbf16>
    %c128 = arith.constant 128 : index
    %c0_11 = arith.constant 0 : index
    %13 = vector.load %arg1[%c128, %c0_11] : memref<256x128xbf16, #tpu.memory_space<vmem>>, vector<32x32xbf16>
    %c128_12 = arith.constant 128 : index
    %c32_13 = arith.constant 32 : index
    %14 = vector.load %arg1[%c128_12, %c32_13] : memref<256x128xbf16, #tpu.memory_space<vmem>>, vector<32x32xbf16>
    %c128_14 = arith.constant 128 : index
    %c64 = arith.constant 64 : index
    %15 = vector.load %arg1[%c128_14, %c64] : memref<256x128xbf16, #tpu.memory_space<vmem>>, vector<32x32xbf16>
    %c160 = arith.constant 160 : index
    %c0_15 = arith.constant 0 : index
    %16 = vector.load %arg1[%c160, %c0_15] : memref<256x128xbf16, #tpu.memory_space<vmem>>, vector<64x32xbf16>
    %c224 = arith.constant 224 : index
    %c0_16 = arith.constant 0 : index
    %17 = vector.load %arg1[%c224, %c0_16] : memref<256x128xbf16, #tpu.memory_space<vmem>>, vector<32x32xbf16>
    %c0_17 = arith.constant 0 : index
    %c0_18 = arith.constant 0 : index
    %18 = vector.load %arg2[%c0_17, %c0_18] : memref<8x128xf32, #tpu.memory_space<vmem>>, vector<1x64xf32>
    %c0_19 = arith.constant 0 : index
    %c64_20 = arith.constant 64 : index
    %19 = vector.load %arg2[%c0_19, %c64_20] : memref<8x128xf32, #tpu.memory_space<vmem>>, vector<1x64xf32>
    %c1 = arith.constant 1 : index
    %c0_21 = arith.constant 0 : index
    %20 = vector.load %arg2[%c1, %c0_21] : memref<8x128xf32, #tpu.memory_space<vmem>>, vector<1x96xf32>
    %c2 = arith.constant 2 : index
    %c0_22 = arith.constant 0 : index
    %21 = vector.load %arg2[%c2, %c0_22] : memref<8x128xf32, #tpu.memory_space<vmem>>, vector<1x96xf32>
    %c3 = arith.constant 3 : index
    %c0_23 = arith.constant 0 : index
    %22 = vector.load %arg2[%c3, %c0_23] : memref<8x128xf32, #tpu.memory_space<vmem>>, vector<1x32xf32>
    %c3_24 = arith.constant 3 : index
    %c32_25 = arith.constant 32 : index
    %23 = vector.load %arg2[%c3_24, %c32_25] : memref<8x128xf32, #tpu.memory_space<vmem>>, vector<1x32xf32>
    %c3_26 = arith.constant 3 : index
    %c64_27 = arith.constant 64 : index
    %24 = vector.load %arg2[%c3_26, %c64_27] : memref<8x128xf32, #tpu.memory_space<vmem>>, vector<1x32xf32>
    %c3_28 = arith.constant 3 : index
    %c96_29 = arith.constant 96 : index
    %25 = vector.load %arg2[%c3_28, %c96_29] : memref<8x128xf32, #tpu.memory_space<vmem>>, vector<1x32xf32>
    %cst = arith.constant dense<0.000000e+00> : vector<16x32xf32>
    %26 = tpu.matmul %1, %17, %cst {dimension_numbers = #tpu.dot_dimension_numbers<[1], [0], [0], [1], [0, 0, 1, 1], [], []>} : vector<16x32xbf16>, vector<32x32xbf16>, vector<16x32xf32> -> vector<16x32xf32>
    %27 = vector.shape_cast %18 : vector<1x64xf32> to vector<1x64xf32>
    %28 = vector.broadcast %27 : vector<1x64xf32> to vector<16x64xf32>
    %29 = vector.shape_cast %19 : vector<1x64xf32> to vector<1x64xf32>
    %30 = vector.broadcast %29 : vector<1x64xf32> to vector<16x64xf32>
    %31 = vector.shape_cast %20 : vector<1x96xf32> to vector<1x96xf32>
    %32 = vector.broadcast %31 : vector<1x96xf32> to vector<16x96xf32>
    %33 = vector.shape_cast %21 : vector<1x96xf32> to vector<1x96xf32>
    %34 = vector.broadcast %33 : vector<1x96xf32> to vector<16x96xf32>
    %35 = arith.truncf %26 : vector<16x32xf32> to vector<16x32xbf16>
    %cst_30 = arith.constant dense<0.000000e+00> : vector<16x64xf32>
    %36 = tpu.matmul %35, %10, %cst_30 {dimension_numbers = #tpu.dot_dimension_numbers<[1], [0], [0], [1], [0, 0, 1, 1], [], []>} : vector<16x32xbf16>, vector<32x64xbf16>, vector<16x64xf32> -> vector<16x64xf32>
    %37 = arith.addf %36, %28 : vector<16x64xf32>
    %38 = vector.extract_strided_slice %37 {offsets = [0, 0], sizes = [16, 32], strides = [1, 1]} : vector<16x64xf32> to vector<16x32xf32>
    %39 = arith.truncf %38 : vector<16x32xf32> to vector<16x32xbf16>
    %cst_31 = arith.constant dense<0.000000e+00> : vector<16x32xf32>
    %40 = tpu.matmul %3, %39, %cst_31 {dimension_numbers = #tpu.dot_dimension_numbers<[1], [0], [0], [1], [0, 0, 1, 1], [], []>} : vector<16x16xbf16>, vector<16x32xbf16>, vector<16x32xf32> -> vector<16x32xf32>
    %41 = vector.extract_strided_slice %37 {offsets = [0, 32], sizes = [16, 32], strides = [1, 1]} : vector<16x64xf32> to vector<16x32xf32>
    %42 = arith.truncf %41 : vector<16x32xf32> to vector<16x32xbf16>
    %cst_32 = arith.constant dense<0.000000e+00> : vector<16x32xf32>
    %43 = tpu.matmul %5, %42, %cst_32 {dimension_numbers = #tpu.dot_dimension_numbers<[1], [0], [0], [1], [0, 0, 1, 1], [], []>} : vector<16x16xbf16>, vector<16x32xbf16>, vector<16x32xf32> -> vector<16x32xf32>
    %44 = tpu.concatenate %40, %43 in 1 : vector<16x32xf32>, vector<16x32xf32> -> vector<16x64xf32>
    %45 = arith.addf %44, %30 : vector<16x64xf32>
    %46 = arith.truncf %45 : vector<16x64xf32> to vector<16x64xbf16>
    %cst_33 = arith.constant dense<0.000000e+00> : vector<16x96xf32>
    %47 = tpu.matmul %46, %11, %cst_33 {dimension_numbers = #tpu.dot_dimension_numbers<[1], [0], [0], [1], [0, 0, 1, 1], [], []>} : vector<16x64xbf16>, vector<64x96xbf16>, vector<16x96xf32> -> vector<16x96xf32>
    %48 = arith.addf %47, %32 : vector<16x96xf32>
    %cst_34 = arith.constant dense<0.000000e+00> : vector<16x96xf32>
    %49 = tpu.matmul %35, %12, %cst_34 {dimension_numbers = #tpu.dot_dimension_numbers<[1], [0], [0], [1], [0, 0, 1, 1], [], []>} : vector<16x32xbf16>, vector<32x96xbf16>, vector<16x96xf32> -> vector<16x96xf32>
    %50 = arith.addf %49, %34 : vector<16x96xf32>
    %51 = vector.extract_strided_slice %48 {offsets = [0, 0], sizes = [16, 32], strides = [1, 1]} : vector<16x96xf32> to vector<16x32xf32>
    %52 = vector.extract_strided_slice %50 {offsets = [0, 0], sizes = [16, 32], strides = [1, 1]} : vector<16x96xf32> to vector<16x32xf32>
    %53 = arith.addf %51, %52 : vector<16x32xf32>
    %54 = arith.negf %53 : vector<16x32xf32>
    %55 = math.exp %54 : vector<16x32xf32>
    %cst_35 = arith.constant 1.000000e+00 : f32
    %56 = vector.broadcast %cst_35 : f32 to vector<16x32xf32>
    %57 = arith.addf %56, %55 : vector<16x32xf32>
    %58 = arith.divf %56, %57 : vector<16x32xf32>
    %59 = vector.extract_strided_slice %48 {offsets = [0, 32], sizes = [16, 32], strides = [1, 1]} : vector<16x96xf32> to vector<16x32xf32>
    %60 = vector.extract_strided_slice %50 {offsets = [0, 32], sizes = [16, 32], strides = [1, 1]} : vector<16x96xf32> to vector<16x32xf32>
    %61 = arith.addf %59, %60 : vector<16x32xf32>
    %62 = arith.negf %61 : vector<16x32xf32>
    %63 = math.exp %62 : vector<16x32xf32>
    %cst_36 = arith.constant 1.000000e+00 : f32
    %64 = vector.broadcast %cst_36 : f32 to vector<16x32xf32>
    %65 = arith.addf %64, %63 : vector<16x32xf32>
    %66 = arith.divf %64, %65 : vector<16x32xf32>
    %67 = vector.extract_strided_slice %48 {offsets = [0, 64], sizes = [16, 32], strides = [1, 1]} : vector<16x96xf32> to vector<16x32xf32>
    %68 = vector.extract_strided_slice %50 {offsets = [0, 64], sizes = [16, 32], strides = [1, 1]} : vector<16x96xf32> to vector<16x32xf32>
    %69 = arith.mulf %58, %68 : vector<16x32xf32>
    %70 = arith.addf %67, %69 : vector<16x32xf32>
    %71 = math.tanh %70 : vector<16x32xf32>
    %72 = arith.subf %26, %71 : vector<16x32xf32>
    %73 = arith.mulf %66, %72 : vector<16x32xf32>
    %74 = arith.addf %71, %73 : vector<16x32xf32>
    %75 = arith.truncf %74 : vector<16x32xf32> to vector<16x32xbf16>
    %cst_37 = arith.constant dense<0.000000e+00> : vector<18x32xf32>
    %76 = tpu.matmul %7, %75, %cst_37 {dimension_numbers = #tpu.dot_dimension_numbers<[1], [0], [0], [1], [0, 0, 1, 1], [], []>} : vector<18x16xbf16>, vector<16x32xbf16>, vector<18x32xf32> -> vector<18x32xf32>
    %77 = vector.extract_strided_slice %76 {offsets = [0, 0], sizes = [16, 32], strides = [1, 1]} : vector<18x32xf32> to vector<16x32xf32>
    %78 = vector.extract_strided_slice %76 {offsets = [16, 0], sizes = [2, 32], strides = [1, 1]} : vector<18x32xf32> to vector<2x32xf32>
    %79 = arith.truncf %78 : vector<2x32xf32> to vector<2x32xbf16>
    %cst_38 = arith.constant dense<0.000000e+00> : vector<2x32xf32>
    %80 = tpu.matmul %79, %13, %cst_38 {dimension_numbers = #tpu.dot_dimension_numbers<[1], [0], [0], [1], [0, 0, 1, 1], [], []>} : vector<2x32xbf16>, vector<32x32xbf16>, vector<2x32xf32> -> vector<2x32xf32>
    %81 = vector.broadcast %22 : vector<1x32xf32> to vector<2x32xf32>
    %82 = arith.addf %80, %81 : vector<2x32xf32>
    %83 = arith.truncf %77 : vector<16x32xf32> to vector<16x32xbf16>
    %cst_39 = arith.constant dense<0.000000e+00> : vector<16x32xf32>
    %84 = tpu.matmul %83, %14, %cst_39 {dimension_numbers = #tpu.dot_dimension_numbers<[1], [0], [0], [1], [0, 0, 1, 1], [], []>} : vector<16x32xbf16>, vector<32x32xbf16>, vector<16x32xf32> -> vector<16x32xf32>
    %85 = vector.broadcast %23 : vector<1x32xf32> to vector<16x32xf32>
    %86 = arith.addf %84, %85 : vector<16x32xf32>
    %87 = vector.shape_cast %82 : vector<2x32xf32> to vector<2x1x32xf32>
    %88 = vector.shape_cast %87 : vector<2x1x32xf32> to vector<2x1x32xf32>
    %89 = vector.broadcast %88 : vector<2x1x32xf32> to vector<2x8x32xf32>
    %90 = vector.shape_cast %89 : vector<2x8x32xf32> to vector<16x32xf32>
    %91 = arith.addf %90, %86 : vector<16x32xf32>
    %92 = arith.negf %91 : vector<16x32xf32>
    %93 = math.exp %92 : vector<16x32xf32>
    %cst_40 = arith.constant 1.000000e+00 : f32
    %94 = vector.broadcast %cst_40 : f32 to vector<16x32xf32>
    %95 = arith.addf %94, %93 : vector<16x32xf32>
    %96 = arith.divf %94, %95 : vector<16x32xf32>
    %97 = arith.truncf %96 : vector<16x32xf32> to vector<16x32xbf16>
    %cst_41 = arith.constant dense<0.000000e+00> : vector<16x32xf32>
    %98 = tpu.matmul %97, %15, %cst_41 {dimension_numbers = #tpu.dot_dimension_numbers<[1], [0], [0], [1], [0, 0, 1, 1], [], []>} : vector<16x32xbf16>, vector<32x32xbf16>, vector<16x32xf32> -> vector<16x32xf32>
    %99 = vector.broadcast %24 : vector<1x32xf32> to vector<16x32xf32>
    %100 = arith.addf %98, %99 : vector<16x32xf32>
    %101 = arith.mulf %100, %77 : vector<16x32xf32>
    %102 = arith.truncf %101 : vector<16x32xf32> to vector<16x32xbf16>
    %cst_42 = arith.constant dense<0.000000e+00> : vector<2x32xf32>
    %103 = tpu.matmul %9, %102, %cst_42 {dimension_numbers = #tpu.dot_dimension_numbers<[1], [0], [0], [1], [0, 0, 1, 1], [], []>} : vector<2x16xbf16>, vector<16x32xbf16>, vector<2x32xf32> -> vector<2x32xf32>
    %104 = tpu.concatenate %103, %78 in 1 : vector<2x32xf32>, vector<2x32xf32> -> vector<2x64xf32>
    %105 = arith.truncf %104 : vector<2x64xf32> to vector<2x64xbf16>
    %cst_43 = arith.constant dense<0.000000e+00> : vector<2x32xf32>
    %106 = tpu.matmul %105, %16, %cst_43 {dimension_numbers = #tpu.dot_dimension_numbers<[1], [0], [0], [1], [0, 0, 1, 1], [], []>} : vector<2x64xbf16>, vector<64x32xbf16>, vector<2x32xf32> -> vector<2x32xf32>
    %107 = vector.broadcast %25 : vector<1x32xf32> to vector<2x32xf32>
    %108 = arith.addf %106, %107 : vector<2x32xf32>
    %c0_44 = arith.constant 0 : index
    %c0_45 = arith.constant 0 : index
    %109 = vector.load %arg3[%c0_44, %c0_45] : memref<16x32xf32, #tpu.memory_space<vmem>>, vector<16x32xf32>
    tpu.vector_store %arg3[%c0_44, %c0_45], %77 {strides = array<i32>} : memref<16x32xf32, #tpu.memory_space<vmem>>, vector<16x32xf32>,
    %c0_46 = arith.constant 0 : index
    %c0_47 = arith.constant 0 : index
    %110 = vector.load %arg4[%c0_46, %c0_47] : memref<2x32xf32, #tpu.memory_space<vmem>>, vector<2x32xf32>
    tpu.vector_store %arg4[%c0_46, %c0_47], %108 {strides = array<i32>} : memref<2x32xf32, #tpu.memory_space<vmem>>, vector<2x32xf32>,
    return
  }
}

</mosaic_0001>

<bundles_post_ra>
// kernel: tpu_custom_call.1
= control target key start
LH: loop header
LB: loop body
LE: loop exit
PB: predicated region body
PF: predicated region fallthrough
CT: control target
= control target key end

     0   :  { %10 = vsyncpa [#allocation3], 0  ;;  %s1416_s0 = inlined_call_operand.vmem [shape: f32[64,32], index: 0, kind: input, shape index: {}]   ;;  %s1417_s1 = inlined_call_operand.hbm [shape: bf16[256,128], index: 1, kind: input, shape index: {}]   ;;  %s1418_s2 = inlined_call_operand.vmem [shape: f32[8,128], index: 2, kind: input, shape index: {}]   ;;  %s1419_s3 = inlined_call_operand.hbm [shape: f32[16,32], index: 3, kind: output, shape index: {0}]   ;;  %s1420_s4 = inlined_call_operand.hbm [shape: f32[2,32], index: 4, kind: output, shape index: {1}]  }
   0x1   :  { %11 = vsyncpa [#allocation4], 0 }
   0x2   :  { %12 = vsyncpa [#allocation7], 0  ;;  %s1227_s15 = smov [#allocation2]  }
   0x3   :  { %s20_s16 = sshll.u32 %s1227_s15, 4  ;;  %s21_s16 = int_to_ptr.vmem [resolvable:$true] %s20_s16 }
   0x4   :  { %s1169_s17 = scalar_lea.vmem %s21_s16, 2048  ;;  %p1174_p1 = scmp.lt.s32.totalorder %s21_s16, %s21_s16 }
   0x5   :  { %p1170_p0 = scmp.ne.s32.totalorder %s21_s16, %s1169_s17  ;;  %p1175_p2 = scmp.lt.s32.totalorder %s1169_s17, %s1169_s17 }
   0x7   :  { %p1176_p3 = por %p1175_p2, %p1174_p1 }
   0x9   :  { %p1177_p4 = pnand %p1176_p3, %p1170_p0 }
   0xb   :  { %1180 = shalt.err (!%p1177_p4)
}
   0xc   :  { %s1228_s18 = smov 64   ;;  %s1229_s19 = smov 4  }
   0xd   :  { %26 = dma.hbm_to_vmem [thread:$0]  %s1417_s1, 2048, %s21_s16, [#allocation3], %s1228_s18, %s1228_s18, %s1229_s19  }
   0xe   :  { %1221 = dma.done.wait [#allocation3], 2048  }
   0xf   :  { %1222 = vsyncadd [#allocation3], 4294965248  ;;  %v1230_v0 = vmov 0.0   ;;  %vm1231_vm0 = vmmov 0   ;;  %v1125_v1 = vld [vmem:[#allocation2 + $0x78] sm:$0xff]   ;;  %v1126_v2 = vld [vmem:[#allocation2 + $0x70] sm:$0xff]  }
  0x10   :  { %1016 = vmatprep.subr.bf16.mxu1 %v1230_v0  ;;  %1020 = vmatprep.mubr.msk.bf16.mxu1 %vm1231_vm0, %v1230_v0  ;;  %v33_v3 = vld [vmem:[%s1416_s0] sm:$0xff]  ;;  %v34_v4 = vld [vmem:[%s1416_s0 + $0x8] sm:$0xff]  ;;  %vm94_vm1 = vcmask 261120   ;;  %v36_v20 = vld [vmem:[%s1416_s0 + $0x10] sm:$0xff]  ;;  %s1232_s5 = smov 96   ;;  %vm209_vm2 = vcmask 130048  }
  0x11   :  { %1032 = vmatprep.subr.bf16.mxu0 %v1230_v0  ;;  %1034 = vmatprep.mubr.msk.bf16.mxu0 %vm1231_vm0, %v1230_v0  ;;  %v35_v5 = vpack.c.bf16 %v34_v4, %v33_v3  ;;  %v1127_v6 = vld [vmem:[#allocation2 + $0x8] sm:$0xff]   ;;  %v1128_v7 = vld [vmem:[#allocation2] sm:$0xff]   ;;  %v37_v21 = vld [vmem:[%s1416_s0 + $0x18] sm:$0xff]  ;;  %s1233_s6 = smov 112   ;;  %s1234_s7 = smov 32   ;;  %vm346_vm3 = vcmask 523264  }
  0x12   :  { %1017 = vmatpush3.bf16.msra.mxu1 %v1125_v1  ;;  %v945_v14 = vld [vmem:[%s1418_s2] ss:$0 sm:$0xff]  ;;  %v38_v23 = vpack.c.bf16 %v37_v21, %v36_v20  ;;  %v1129_v25 = vld [vmem:[#allocation2 + $0x38] sm:$0xff]   ;;  %v1130_v27 = vld [vmem:[#allocation2 + $0x30] sm:$0xff]   ;;  %s1236_s21 = smov [#allocation5]  }
  0x13   :  { %1018 = vmatprep.subr.bf16.mxu1 %v1230_v0  ;;  %v1131_v29 = vld [vmem:[#allocation2 + $0x28] sm:$0xff]   ;;  %v1132_v31 = vld [vmem:[#allocation2 + $0x20] sm:$0xff]   ;;  %v1133_v34 = vld [vmem:[#allocation2 + $0x18] sm:$0xff]   ;;  %s916_s22 = sshll.u32 %s1236_s21, 4  ;;  %s917_s22 = int_to_ptr.vmem [resolvable:$true] %s916_s22 }
  0x14   :  { %v1134_v35 = vld [vmem:[#allocation2 + $0x10] sm:$0xff]   ;;  %v947_v40 = vld [vmem:[%s1418_s2 + $0x2] ss:$0 sm:$0xff]  ;;  %v946_v55 = vld [vmem:[%s1418_s2 + $0x1] ss:$0 sm:$0xff]  ;;  %p1186_p6 = scmp.lt.s32.totalorder %s917_s22, %s917_s22 }
  0x16   :  { %1019 = vmatpush3.bf16.msra.mxu1 %v1126_v2 }
  0x17   :  { %1024 = vmatprep.subr.bf16.mxu1 %v1230_v0 }
  0x19   :  { %1021 = vmatmul.mubr.msk.bf16.vlgmr.msra.gmra.mxu1 %vm94_vm1, %v35_v5 }
  0x1a   :  { %1028 = vmatprep.mubr.msk.bf16.mxu1 %vm1231_vm0, %v1230_v0  ;;  %1025 = vmatpush3.bf16.msra.mxu1 %v1127_v6 }
  0x1b   :  { %1026 = vmatprep.subr.bf16.mxu1 %v1230_v0 }
  0x1e   :  { %1027 = vmatpush3.bf16.msra.mxu1 %v1128_v7 }
  0x1f   :  { %1038 = vmatprep.subr.bf16.mxu1 %v1230_v0 }
  0xd9   :  { %v1289_v8 = vpop.f32.mrf.mxu1 }
  0xdb   :  { %v1022_v9 = vpop.f32.mrf.mxu1 }
  0xdd   :  { %v1291_v10 = vpop.f32.mrf.mxu1 }
  0xde   :  { %v151_v11 = vpack.c.bf16 %v1291_v10, %v1289_v8 }
  0xdf   :  { %v1023_v12 = vpop.f32.mrf.mxu1 }
  0xe0   :  { %1029 = vmatmul.mubr.msk.bf16.vlgmr.msra.gmra.mxu1 %vm94_vm1, %v151_v11 }
  0xe1   :  { %1040 = vmatprep.mubr.msk.bf16.mxu1 %vm1231_vm0, %v1230_v0 }
 0x1a0   :  { %v201_v13 = vpop.f32.mrf.mxu1 }
 0x1a1   :  { %v202_v17 = vadd.f32 %v945_v14, %v201_v13 }
 0x1a2   :  { %v1030_v15 = vpop.f32.mrf.mxu1 }
 0x1a4   :  { %v204_v16 = vpop.f32.mrf.mxu1 }
 0x1a5   :  { %v205_v18 = vadd.f32 %v945_v14, %v204_v16 }
 0x1a6   :  { %v1031_v19 = vpop.f32.mrf.mxu1 }
 0x1a7   :  { %v208_v22 = vpack.c.bf16 %v205_v18, %v202_v17 }
 0x1a9   :  { %258 = vrot.lane.b32.xlu0 %v208_v22, %s1232_s5  ;;  %1033 = vmatpush3.bf16.msra.mxu0 %v208_v22 }
 0x1aa   :  { %1044 = vmatprep.subr.bf16.mxu0 %v1230_v0 }
 0x1ac   :  { %1035 = vmatmul.mubr.msk.bf16.vlgmr.msra.gmra.mxu0 %vm209_vm2, %v38_v23 }
 0x1ad   :  { %255 = vrot.lane.b32.xlu0 %v38_v23, %s1233_s6  ;;  %1052 = vmatprep.mubr.msk.bf16.mxu0 %vm1231_vm0, %v1230_v0 }
 0x1ae   :  { %1045 = vmatpush3.bf16.msra.mxu0 %v1131_v29  ;;  %v39_v29 = vld [vmem:[%s1416_s0 + $0x20] sm:$0xff] }
 0x1af   :  { %1046 = vmatprep.subr.bf16.mxu0 %v1230_v0 }
 0x1b1   :  { %316 = vrot.lane.b32.xlu0 %v945_v14, %s1228_s18 }
 0x1b2   :  { %1047 = vmatpush3.bf16.msra.mxu0 %v1132_v31 }
 0x1b3   :  { %1048 = vmatprep.subr.bf16.mxu0 %v1230_v0 }
 0x1b6   :  { %1049 = vmatpush3.bf16.msra.mxu0 %v1133_v34  ;;  %v1136_v34 = vld [vmem:[#allocation2 + $0x40] sm:$0xff]  }
 0x1b7   :  { %1050 = vmatprep.subr.bf16.mxu0 %v1230_v0 }
 0x1ba   :  { %1051 = vmatpush3.bf16.msra.mxu0 %v1134_v35 }
 0x1bb   :  { %1070 = vmatprep.subr.bf16.mxu0 %v1230_v0 }
 0x21b   :  { %v259_v24 = vpop.permute.xlu0 %258 }
 0x21c   :  { %1039 = vmatpush3.bf16.msra.mxu1 %v259_v24 }
 0x21d   :  { %1056 = vmatprep.subr.bf16.mxu1 %v1230_v0 }
 0x21f   :  { %v256_v26 = vpop.permute.xlu0 %255 }
 0x220   :  { %1041 = vmatmul.mubr.msk.bf16.vlgmr.msra.gmra.mxu1 %vm209_vm2, %v256_v26 }
 0x221   :  { %1057 = vmatpush3.bf16.msra.mxu1 %v1129_v25  ;;  %1060 = vmatprep.mubr.msk.bf16.mxu1 %vm1231_vm0, %v1230_v0 }
 0x222   :  { %1058 = vmatprep.subr.bf16.mxu1 %v1230_v0 }
 0x223   :  { %v317_v49 = vpop.permute.xlu0 %316 }
 0x225   :  { %1059 = vmatpush3.bf16.msra.mxu1 %v1130_v27 }
 0x228   :  { %1061 = vmatmul.mubr.msk.bf16.vlgmr.msra.gmra.mxu1 %vm94_vm1, %v151_v11 }
 0x26c   :  { %v247_v28 = vpop.f32.mrf.mxu0 }
 0x26e   :  { %v1036_v30 = vpop.f32.mrf.mxu0 }
 0x270   :  { %v250_v32 = vpop.f32.mrf.mxu0 }
 0x272   :  { %v1037_v33 = vpop.f32.mrf.mxu0 }
 0x2e0   :  { %v298_v36 = vpop.f32.mrf.mxu1 }
 0x2e1   :  { %307 = vrot.lane.b32.xlu1 %v298_v36, %s1234_s7 }
 0x2e2   :  { %v1042_v37 = vpop.f32.mrf.mxu1 }
 0x2e4   :  { %v301_v38 = vpop.f32.mrf.mxu1 }
 0x2e5   :  { %309 = vrot.lane.b32.xlu1 %v301_v38, %s1234_s7  ;;  %v41_v38 = vld [vmem:[%s1416_s0 + $0x30] sm:$0x3] }
 0x2e6   :  { %v1043_v39 = vpop.f32.mrf.mxu1 }
 0x2e8   :  { %v437_v41 = vpop.f32.mrf.mxu1 }
 0x2e9   :  { %v438_v42 = vadd.f32 %v947_v40, %v437_v41 }
 0x2ea   :  { %v1062_v43 = vpop.f32.mrf.mxu1 }
 0x2eb   :  { %460 = vrot.lane.b32.xlu1 %v438_v42, %s1228_s18 }
 0x2ec   :  { %v440_v44 = vpop.f32.mrf.mxu1 }
 0x2ed   :  { %v441_v45 = vadd.f32 %v947_v40, %v440_v44  ;;  %v43_v40 = vpack.c.bf16 %v41_v38, %v41_v38 }
 0x2ee   :  { %v1063_v46 = vpop.f32.mrf.mxu1 }
 0x2ef   :  { %462 = vrot.lane.b32.xlu0 %v441_v45, %s1228_s18 }
 0x353   :  { %v308_v47 = vpop.permute.xlu1 %307 }
 0x354   :  { %v313_v48 = vsel %vm94_vm1, %v247_v28, %v308_v47 }
 0x355   :  { %v319_v52 = vadd.f32 %v317_v49, %v313_v48 }
 0x357   :  { %v310_v50 = vpop.permute.xlu1 %309 }
 0x358   :  { %v314_v51 = vsel %vm94_vm1, %v250_v32, %v310_v50  ;;  %v965_v32 = vld [vmem:[%s1418_s2 + $0x3] ss:$0 sm:$0xff] }
 0x359   :  { %v320_v53 = vadd.f32 %v317_v49, %v314_v51 }
 0x35b   :  { %v321_v54 = vpack.c.bf16 %v320_v53, %v319_v52  ;;  %v1235_v52 = vmov 1966171168  }
 0x35c   :  { %v686_v53 = vunpack.c.l.s4 %v1235_v52 }
 0x35d   :  { %1053 = vmatmul.mubr.msk.bf16.vlgmr.msra.gmra.mxu0 %vm346_vm3, %v321_v54  ;;  %v461_v9 = vpop.permute.xlu1 %460  ;;  %v688_v54 = vlaneseq }
 0x35e   :  { %1074 = vmatprep.mubr.msk.bf16.mxu0 %vm1231_vm0, %v1230_v0 }
 0x361   :  { %v463_v13 = vpop.permute.xlu0 %462 }
 0x41d   :  { %v384_v56 = vpop.f32.mrf.mxu0 }
 0x41e   :  { %v385_v57 = vadd.f32 %v946_v55, %v384_v56  ;;  %v689_v56 = vshrl.u32 %v688_v54, 7 }
 0x41f   :  { %v1054_v58 = vpop.f32.mrf.mxu0 }
 0x420   :  { %v444_v59 = vadd.f32 %v438_v42, %v385_v57 }
 0x421   :  { %v387_v60 = vpop.f32.mrf.mxu0 }
 0x422   :  { %v961_v61 = vmul.f32 -1.442695, %v444_v59  ;;  %v388_v62 = vadd.f32 %v946_v55, %v387_v60  ;;  %v687_v55 = vunpack.c.0.s8 %v686_v53 }
 0x423   :  { %v1055_v63 = vpop.f32.mrf.mxu0 }
 0x424   :  { %1141 = vpow2.f32 %v961_v61  ;;  %v445_v1 = vadd.f32 %v441_v45, %v388_v62 }
 0x426   :  { %v962_v2 = vmul.f32 -1.442695, %v445_v1 }
 0x428   :  { %1143 = vpow2.f32 %v962_v2 }
 0x431   :  { %v1142_v3 = vpop.eup %1141 }
 0x432   :  { %v452_v4 = vadd.f32 1.0, %v1142_v3 }
 0x434   :  { %1145 = vrcp.f32 %v452_v4 }
 0x435   :  { %v1144_v5 = vpop.eup %1143 }
 0x436   :  { %v453_v6 = vadd.f32 1.0, %v1144_v5 }
 0x438   :  { %1147 = vrcp.f32 %v453_v6 }
 0x441   :  { %v1146_v7 = vpop.eup %1145 }
 0x442   :  { %v466_v11 = vmul.f32 %v1146_v7, %v461_v9 }
 0x444   :  { %470 = vrot.lane.b32.xlu1 %v466_v11, %s1228_s18 }
 0x445   :  { %v1148_v12 = vpop.eup %1147 }
 0x446   :  { %v467_v14 = vmul.f32 %v1148_v12, %v463_v13 }
 0x448   :  { %472 = vrot.lane.b32.xlu0 %v467_v14, %s1228_s18 }
 0x4b6   :  { %v471_v15 = vpop.permute.xlu1 %470 }
 0x4b7   :  { %v476_v16 = vadd.f32 %v471_v15, %v385_v57  ;;  %v690_v57 = vsub.s32 %v687_v55, %v689_v56 }
 0x4b9   :  { %1149 = vtanh.f32 %v476_v16 }
 0x4ba   :  { %v473_v17 = vpop.permute.xlu0 %472 }
 0x4bb   :  { %v477_v18 = vadd.f32 %v473_v17, %v388_v62  ;;  %v709_v62 = vsub.s32 0, %v689_v56 }
 0x4bd   :  { %1151 = vtanh.f32 %v477_v18 }
 0x4c6   :  { %v1150_v19 = vpop.eup %1149 }
 0x4c7   :  { %482 = vrot.lane.b32.xlu1 %v1150_v19, %s1228_s18 }
 0x4ca   :  { %v1152_v20 = vpop.eup %1151 }
 0x4cb   :  { %484 = vrot.lane.b32.xlu0 %v1152_v20, %s1228_s18 }
 0x539   :  { %v483_v21 = vpop.permute.xlu1 %482 }
 0x53a   :  { %v488_v22 = vsub.f32 %v1289_v8, %v483_v21  ;;  %v40_v8 = vld [vmem:[%s1416_s0 + $0x28] sm:$0xff] }
 0x53b   :  { %v42_v30 = vpack.c.bf16 %v40_v8, %v39_v29 }
 0x53c   :  { %492 = vrot.lane.b32.xlu1 %v488_v22, %s1234_s7 }
 0x53d   :  { %v485_v23 = vpop.permute.xlu0 %484  ;;  %1066 = vmatprep.mubr.msk.bf16.mxu1 %vm209_vm2, %v42_v30 }
 0x53e   :  { %v489_v24 = vsub.f32 %v1291_v10, %v485_v23  ;;  %v1135_v10 = vld [vmem:[#allocation2 + $0x48] sm:$0xff]  }
 0x53f   :  { %1071 = vmatpush3.bf16.msra.mxu0 %v1135_v10 }
 0x540   :  { %494 = vrot.lane.b32.xlu0 %v489_v24, %s1234_s7  ;;  %1072 = vmatprep.subr.bf16.mxu0 %v1230_v0 }
 0x543   :  { %1073 = vmatpush3.bf16.msra.mxu0 %v1136_v34 }
 0x544   :  { %1086 = vmatprep.subr.bf16.mxu0 %v1230_v0 }
 0x5ae   :  { %v493_v25 = vpop.permute.xlu1 %492 }
 0x5af   :  { %v498_v26 = vmul.f32 %v1146_v7, %v493_v25 }
 0x5b1   :  { %502 = vrot.lane.b32.xlu1 %v498_v26, %s1234_s7  ;;  %v1137_v26 = vld [vmem:[#allocation2 + $0x68] sm:$0xff]  }
 0x5b2   :  { %v495_v27 = vpop.permute.xlu0 %494 }
 0x5b3   :  { %v499_v28 = vmul.f32 %v1148_v12, %v495_v27  ;;  %v1138_v27 = vld [vmem:[#allocation2 + $0x60] sm:$0xff]  }
 0x5b5   :  { %504 = vrot.lane.b32.xlu0 %v499_v28, %s1234_s7  ;;  %v1139_v28 = vld [vmem:[#allocation2 + $0x58] sm:$0xff]  }
 0x5b9   :  { %632 = vrot.lane.b32.xlu0 %v1135_v10, %s1232_s5 }
 0x5bd   :  { %637 = vrot.lane.b32.xlu0 %v965_v32, %s1232_s5 }
 0x5c1   :  { %732 = vrot.lane.b32.xlu0 %v1136_v34, %s1228_s18 }
 0x623   :  { %v503_v31 = vpop.permute.xlu1 %502 }
 0x624   :  { %v508_v35 = vadd.f32 %v1150_v19, %v503_v31 }
 0x627   :  { %v505_v33 = vpop.permute.xlu0 %504 }
 0x628   :  { %v509_v36 = vadd.f32 %v1152_v20, %v505_v33 }
 0x62a   :  { %v510_v37 = vpack.c.bf16 %v509_v36, %v508_v35  ;;  %v44_v36 = vld [vmem:[%s1416_s0 + $0x38] sm:$0x3]  ;;  %s1181_s0 = scalar_lea.vmem %s917_s22, 256 }
 0x62b   :  { %v633_v41 = vpop.permute.xlu0 %632  ;;  %v45_v38 = vpack.c.bf16 %v44_v36, %v44_v36  ;;  %p1182_p5 = scmp.ne.s32.totalorder %s917_s22, %s1181_s0  ;;  %p1187_p7 = scmp.lt.s32.totalorder %s1181_s0, %s1181_s0 }
 0x62c   :  { %512 = vrot.lane.b32.xlu1 %v510_v37, %s1228_s18 }
 0x62d   :  { %p1188_p8 = por %p1187_p7, %p1186_p6 }
 0x62f   :  { %v638_v49 = vpop.permute.xlu0 %637  ;;  %p1189_p9 = pnand %p1188_p8, %p1182_p5 }
 0x630   :  { %630 = vrot.lane.b32.xlu1 %v1136_v34, %s1232_s5 }
 0x633   :  { %v733_v51 = vpop.permute.xlu0 %732 }
 0x634   :  { %734 = vrot.lane.b32.xlu1 %v1135_v10, %s1228_s18 }
 0x638   :  { %738 = vrot.lane.b32.xlu1 %v965_v32, %s1228_s18 }
 0x63c   :  { %861 = vrot.lane.b32.xlu1 %v965_v32, %s1234_s7 }
 0x69e   :  { %v513_v39 = vpop.permute.xlu1 %512 }
 0x69f   :  { %1064 = vmatprep.subr.bf16.mxu1 %v513_v39 }
 0x6a0   :  { %1065 = vmatpush3.bf16.msra.mxu1 %v513_v39 }
 0x6a1   :  { %1078 = vmatprep.subr.bf16.mxu1 %v1230_v0 }
 0x6a2   :  { %v631_v42 = vpop.permute.xlu1 %630 }
 0x6a3   :  { %1067 = vmatmul.mubr.msk.bf16.vlgmr.msra.gmra.mxu1 %vm209_vm2, %v43_v40 }
 0x6a4   :  { %1082 = vmatprep.mubr.msk.bf16.mxu1 %vm1231_vm0, %v1230_v0  ;;  %1079 = vmatpush3.bf16.msra.mxu1 %v633_v41 }
 0x6a5   :  { %1080 = vmatprep.subr.bf16.mxu1 %v1230_v0 }
 0x6a6   :  { %v735_v50 = vpop.permute.xlu1 %734 }
 0x6a8   :  { %1081 = vmatpush3.bf16.msra.mxu1 %v631_v42 }
 0x6a9   :  { %1094 = vmatprep.subr.bf16.mxu1 %v1230_v0 }
 0x6aa   :  { %v739_v29 = vpop.permute.xlu1 %738 }
 0x763   :  { %v1068_v43 = vpop.f32.mrf.mxu1 }
 0x764   :  { %v569_v44 = vpack.c.bf16 %v1068_v43, %v1068_v43  ;;  %832 = vrot.lane.b32.xlu0 %v1068_v43, %s1234_s7 }
 0x765   :  { %v1378_v45 = vpop.f32.mrf.mxu1 }
 0x766   :  { %907 = vst.msk [vmem:[#allocation5] sm:$0xff] %vm94_vm1, %v1378_v45  ;;  %1075 = vmatmul.mubr.msk.bf16.vlgmr.msra.gmra.mxu0 %vm94_vm1, %v569_v44 }
 0x767   :  { %v1069_v46 = vpop.f32.mrf.mxu1  ;;  %1090 = vmatprep.mubr.msk.bf16.mxu0 %vm1231_vm0, %v1230_v0  ;;  %1087 = vmatpush3.bf16.msra.mxu0 %v735_v50 }
 0x768   :  { %1088 = vmatprep.subr.bf16.mxu0 %v1230_v0 }
 0x769   :  { %v1385_v47 = vpop.f32.mrf.mxu1 }
 0x76a   :  { %v629_v48 = vpack.c.bf16 %v1385_v47, %v1378_v45  ;;  %908 = vst.msk [vmem:[#allocation5 + $0x8] sm:$0xff] %vm94_vm1, %v1385_v47 }
 0x76b   :  { %1089 = vmatpush3.bf16.msra.mxu0 %v733_v51 }
 0x76c   :  { %1083 = vmatmul.mubr.msk.bf16.vlgmr.msra.gmra.mxu1 %vm94_vm1, %v629_v48  ;;  %1100 = vmatprep.subr.bf16.mxu0 %v1230_v0 }
 0x76d   :  { %1096 = vmatprep.mubr.msk.bf16.mxu1 %vm1231_vm0, %v1230_v0 }
 0x7d6   :  { %v833_v39 = vpop.permute.xlu0 %832 }
 0x826   :  { %v623_v58 = vpop.f32.mrf.mxu0 }
 0x827   :  { %v624_v59 = vadd.f32 %v965_v32, %v623_v58 }
 0x828   :  { %v1076_v60 = vpop.f32.mrf.mxu0 }
 0x829   :  { %v691_v61 = vrot.slane %v624_v59, %v690_v57 }
 0x82a   :  { %v626_v63 = vpop.f32.mrf.mxu0 }
 0x82b   :  { %v692_v1 = vcombine.high %v691_v61, %v691_v61  ;;  %v699_v2 = vrot.slane %v691_v61, %v690_v57 }
 0x82c   :  { %v1077_v3 = vpop.f32.mrf.mxu0  ;;  %v677_v4 = vpop.f32.mrf.mxu1 }
 0x82d   :  { %v678_v5 = vadd.f32 %v677_v4, %v638_v49  ;;  %v710_v6 = vrot.slane %v699_v2, %v709_v62  ;;  %v706_v7 = vrot.slane %v692_v1, %v690_v57 }
 0x82e   :  { %v1084_v9 = vpop.f32.mrf.mxu1 }
 0x82f   :  { %v717_v11 = vadd.f32 %v710_v6, %v678_v5  ;;  %v714_v15 = vrot.slane %v706_v7, %v709_v62 }
 0x830   :  { %v680_v12 = vpop.f32.mrf.mxu1 }
 0x831   :  { %v970_v13 = vmul.f32 -1.442695, %v717_v11  ;;  %v681_v14 = vadd.f32 %v680_v12, %v638_v49 }
 0x832   :  { %v1085_v16 = vpop.f32.mrf.mxu1 }
 0x833   :  { %1153 = vpow2.f32 %v970_v13  ;;  %v718_v17 = vadd.f32 %v714_v15, %v681_v14 }
 0x835   :  { %v971_v18 = vmul.f32 -1.442695, %v718_v17 }
 0x837   :  { %1155 = vpow2.f32 %v971_v18 }
 0x840   :  { %v1154_v19 = vpop.eup %1153 }
 0x841   :  { %v725_v20 = vadd.f32 1.0, %v1154_v19 }
 0x843   :  { %1157 = vrcp.f32 %v725_v20 }
 0x844   :  { %v1156_v21 = vpop.eup %1155 }
 0x845   :  { %v726_v22 = vadd.f32 1.0, %v1156_v21 }
 0x847   :  { %1159 = vrcp.f32 %v726_v22 }
 0x850   :  { %v1158_v23 = vpop.eup %1157 }
 0x854   :  { %v1160_v24 = vpop.eup %1159 }
 0x855   :  { %v731_v25 = vpack.c.bf16 %v1160_v24, %v1158_v23 }
 0x857   :  { %1091 = vmatmul.mubr.msk.bf16.vlgmr.msra.gmra.mxu0 %vm94_vm1, %v731_v25 }
 0x858   :  { %1108 = vmatprep.mubr.msk.bf16.mxu0 %vm1231_vm0, %v1230_v0  ;;  %1101 = vmatpush3.bf16.msra.mxu0 %v1137_v26 }
 0x859   :  { %1102 = vmatprep.subr.bf16.mxu0 %v1230_v0 }
 0x85c   :  { %1103 = vmatpush3.bf16.msra.mxu0 %v1138_v27 }
 0x85d   :  { %1104 = vmatprep.subr.bf16.mxu0 %v1230_v0 }
 0x860   :  { %1105 = vmatpush3.bf16.msra.mxu0 %v1139_v28 }
 0x861   :  { %1106 = vmatprep.subr.bf16.mxu0 %v1230_v0  ;;  %v1140_v0 = vld [vmem:[#allocation2 + $0x50] sm:$0xff]  }
 0x864   :  { %1107 = vmatpush3.bf16.msra.mxu0 %v1140_v0 }
 0x917   :  { %v778_v8 = vpop.f32.mrf.mxu0 }
 0x918   :  { %v779_v10 = vadd.f32 %v778_v8, %v739_v29 }
 0x919   :  { %v1092_v30 = vpop.f32.mrf.mxu0 }
 0x91a   :  { %v785_v34 = vmul.f32 %v779_v10, %v1378_v45 }
 0x91b   :  { %v781_v31 = vpop.f32.mrf.mxu0 }
 0x91c   :  { %v782_v32 = vadd.f32 %v781_v31, %v739_v29 }
 0x91d   :  { %v1093_v33 = vpop.f32.mrf.mxu0 }
 0x91e   :  { %v786_v35 = vmul.f32 %v782_v32, %v1385_v47 }
 0x920   :  { %v787_v37 = vpack.c.bf16 %v786_v35, %v785_v34 }
 0x922   :  { %1095 = vmatpush3.bf16.msra.mxu1 %v787_v37 }
 0x925   :  { %1097 = vmatmul.mubr.msk.bf16.vlgmr.msra.gmra.mxu1 %vm209_vm2, %v45_v38 }
 0x9e5   :  { %v825_v40 = vpop.f32.mrf.mxu1 }
 0x9e6   :  { %v835_v41 = vsel %vm94_vm1, %v825_v40, %v833_v39 }
 0x9e7   :  { %v836_v42 = vpack.c.bf16 %v835_v41, %v835_v41  ;;  %v1098_v43 = vpop.f32.mrf.mxu1 }
 0x9e9   :  { %v828_v44 = vpop.f32.mrf.mxu1  ;;  %1109 = vmatmul.mubr.msk.bf16.vlgmr.msra.gmra.mxu0 %vm346_vm3, %v836_v42 }
 0x9eb   :  { %v1099_v45 = vpop.f32.mrf.mxu1 }
 0x9ec   :  { %1192 = shalt.err (!%p1189_p9)
}
 0x9ed   :  { %s1237_s23 = smov 128   ;;  %s1238_s1 = smov 8   ;;  %v862_v46 = vpop.permute.xlu1 %861  ;;  %vm909_vm4 = vcmask 254976  }
 0x9ee   :  { %922 = dma.vmem_to_hbm [thread:$0]  %s917_s22, 256, %s1419_s3, [#allocation4], %s1237_s23, %s1237_s23, %s1238_s1  }
 0x9ef   :  { %s1239_s26 = smov [#allocation6]  }
 0x9f0   :  { %s929_s27 = sshll.u32 %s1239_s26, 4  ;;  %s930_s27 = int_to_ptr.vmem [resolvable:$true] %s929_s27 }
 0x9f1   :  { %s1201_s28 = scalar_lea.vmem %s930_s27, 32  ;;  %p1206_p11 = scmp.lt.s32.totalorder %s930_s27, %s930_s27 }
 0x9f2   :  { %p1202_p10 = scmp.ne.s32.totalorder %s930_s27, %s1201_s28  ;;  %p1207_p12 = scmp.lt.s32.totalorder %s1201_s28, %s1201_s28 }
 0x9f4   :  { %p1208_p13 = por %p1207_p12, %p1206_p11 }
 0x9f6   :  { %p1209_p0 = pnand %p1208_p13, %p1202_p10 }
 0xaa9   :  { %v901_v47 = vpop.f32.mrf.mxu0 }
 0xaaa   :  { %v902_v48 = vadd.f32 %v901_v47, %v862_v46 }
 0xaab   :  { %v1110_v49 = vpop.f32.mrf.mxu0 }
 0xaac   :  { %910 = vst.msk [vmem:[#allocation6] sm:$0x3] %vm909_vm4, %v902_v48 }
 0xaad   :  { %v904_v50 = vpop.f32.mrf.mxu0 }
 0xaae   :  { %1212 = shalt.err (!%p1209_p0)
}
 0xaaf   :  { %932 = dma.vmem_to_hbm [thread:$0]  %s930_s27, 32, %s1420_s4, [#allocation7]   ;;  %v1111_v51 = vpop.f32.mrf.mxu0 }
 0xab0   :  { %1223 = dma.done.wait [#allocation4], 256  }
 0xab1   :  { %1224 = vsyncadd [#allocation4], 4294967040 }
 0xab2   :  { %1225 = dma.done.wait [#allocation7], 32  }
 0xab3   :  { %1226 = vsyncadd [#allocation7], 4294967264 }
 0xab4   :  { %939 = vsyncpa [#allocation3], 1 }
 0xab5   :  { %940 = vsyncpa [#allocation4], 1 }
 0xab6   :  { %941 = vsyncpa [#allocation7], 1 }

</bundles_post_ra>
